<compile_context>
chip_gen: v7x
topology: tpu7x:2x2x1
jax: 0.10.0
libtpu: 0.0.40
codegen_flags: <defaults>
</compile_context>

<pallas_src>
import functools

import jax
import jax.numpy as jnp
from jax.experimental import pallas as pl
from jax.experimental.pallas import tpu as pltpu


def _gate_kernel(x_ref, w1_ref, b1_ref, w2_ref, b2_ref, o_ref, *, inv_hw):
    # x_ref: (Bt, C, HWp) block of flattened NCHW input (fp32).
    x = x_ref[...]                                            # (Bt, C, HWp)

    # --- global average pool over the (zero-padded) spatial axis ---
    # Padding columns are zero, so the sum is exact; divide by the TRUE H*W.
    pooled = jnp.sum(x, axis=-1) * inv_hw                     # (Bt, C)

    # --- fc1 -> ReLU ---
    h = jnp.dot(pooled, w1_ref[...],
                preferred_element_type=jnp.float32) + b1_ref[...]
    h = jnp.maximum(h, 0.0)                                   # (Bt, Cr)

    # --- fc2 -> sigmoid ---
    g = jnp.dot(h, w2_ref[...],
                preferred_element_type=jnp.float32) + b2_ref[...]
    g = jax.nn.sigmoid(g)                                     # (Bt, C)

    # --- scale input channels (lane broadcast, no transpose) ---
    o_ref[...] = (x * g[:, :, None]).astype(o_ref.dtype)      # (Bt, C, HWp)


def _choose_bt(B, C, HWp, itemsize=4, target_bytes=4 << 20):
    """Largest divisor of B whose (in+out, double-buffered) blocks stay near
    `target_bytes`, while keeping >= 2 grid steps so both v7x TCs get work."""
    per_elem = C * HWp * itemsize * 2 * 2   # x block + out block, x2 buffers
    bt_cap = max(1, target_bytes // per_elem)
    best = 1
    for bt in range(1, B + 1):
        if B % bt != 0 or bt > bt_cap:
            continue
        if B == 1 or (B // bt) >= 2:
            best = max(best, bt)
    return best


def lightweight_gate(x_nchw, w1, b1, w2, b2):
    """x_nchw: (B, C, H, W) float32.  Returns (B, C, H, W)."""
    B, C, H, W = x_nchw.shape
    HW = H * W
    Cr = w1.shape[1]

    # Lane-dense layout: pad H*W up to a multiple of 128 (zero padding is
    # harmless for the mean since we divide by the true HW).
    HWp = ((HW + 127) // 128) * 128
    x_flat = x_nchw.reshape(B, C, HW)
    if HWp != HW:
        x_flat = jnp.pad(x_flat, ((0, 0), (0, 0), (0, HWp - HW)))

    b1_2d = b1.reshape(1, Cr)
    b2_2d = b2.reshape(1, C)

    Bt = _choose_bt(B, C, HWp, itemsize=x_flat.dtype.itemsize)
    grid = (B // Bt,)

    kernel = functools.partial(_gate_kernel, inv_hw=1.0 / HW)

    out_flat = pl.pallas_call(
        kernel,
        out_shape=jax.ShapeDtypeStruct((B, C, HWp), x_nchw.dtype),
        grid_spec=pltpu.PrefetchScalarGridSpec(
            num_scalar_prefetch=0,
            grid=grid,
            in_specs=[
                pl.BlockSpec((Bt, C, HWp), lambda b: (b, 0, 0)),   # x
                pl.BlockSpec((C, Cr), lambda b: (0, 0)),           # w1
                pl.BlockSpec((1, Cr), lambda b: (0, 0)),           # b1
                pl.BlockSpec((Cr, C), lambda b: (0, 0)),           # w2
                pl.BlockSpec((1, C), lambda b: (0, 0)),            # b2
            ],
            out_specs=pl.BlockSpec((Bt, C, HWp), lambda b: (b, 0, 0)),
        ),
        compiler_params=pltpu.CompilerParams(
            dimension_semantics=("parallel",),
        ),
    )(x_flat, w1, b1_2d, w2, b2_2d)

    if HWp != HW:
        out_flat = out_flat[:, :, :HW]
    return out_flat.reshape(B, C, H, W)


def reference_gate(x, w1, b1, w2, b2):
    """Pure-JAX reference mirroring the PyTorch forward."""
    y = jnp.mean(x, axis=(2, 3))                       # (B, C)
    y = jnp.maximum(y @ w1 + b1, 0.0)                  # (B, Cr)
    y = jax.nn.sigmoid(y @ w2 + b2)                    # (B, C)
    return x * y[:, :, None, None]


if __name__ == "__main__":
    # nn.Linear(channels, channels // reduction) requires channels >= reduction;
    # use channels=64, reduction=8 -> hidden=8.
    B, C, H, W = 2, 64, 16, 16
    reduction = 8
    Cr = C // reduction

    key = jax.random.PRNGKey(0)
    kx, kw1, kb1, kw2, kb2 = jax.random.split(key, 5)

    x = jax.random.normal(kx, (B, C, H, W), dtype=jnp.float32)

    # Deterministic synthetic parameters (shapes match nn.Linear weights,
    # stored transposed so the kernel does y @ W).
    w1 = jax.random.normal(kw1, (C, Cr), dtype=jnp.float32) * 0.1
    b1 = jax.random.normal(kb1, (Cr,), dtype=jnp.float32) * 0.1
    w2 = jax.random.normal(kw2, (Cr, C), dtype=jnp.float32) * 0.1
    b2 = jax.random.normal(kb2, (C,), dtype=jnp.float32) * 0.1

    out = lightweight_gate(x, w1, b1, w2, b2)
    out = jax.block_until_ready(out)

    ref = reference_gate(x, w1, b1, w2, b2)
    assert out.shape == (B, C, H, W)
    assert jnp.allclose(out, ref, atol=1e-5, rtol=1e-5), "mismatch vs reference"

    print("KERNEL_OK")
</pallas_src>

<mosaic_0001>
module attributes {stable_mosaic.version = 11 : i64} {
  func.func @_gate_kernel(%arg0: i32, %arg1: memref<1x64x256xf32, #tpu.memory_space<vmem>>, %arg2: memref<64x8xf32, #tpu.memory_space<vmem>>, %arg3: memref<1x8xf32, #tpu.memory_space<vmem>>, %arg4: memref<8x64xf32, #tpu.memory_space<vmem>>, %arg5: memref<1x64xf32, #tpu.memory_space<vmem>>, %arg6: memref<1x64x256xf32, #tpu.memory_space<vmem>>) attributes {dimension_semantics = [#tpu.dimension_semantics<parallel>], iteration_bounds = array<i64: 2>, scalar_prefetch = 0 : i64, scratch_operands = 0 : i64, tpu.core_type = #tpu.core_type<tc>, window_params = [{transform_indices = @transform_0, window_bounds = array<i64: 1, 64, 256>}, {pipeline_mode = #tpu.pipeline_mode<synchronous>, transform_indices = @transform_1, window_bounds = array<i64: 64, 8>}, {pipeline_mode = #tpu.pipeline_mode<synchronous>, transform_indices = @transform_2, window_bounds = array<i64: 1, 8>}, {pipeline_mode = #tpu.pipeline_mode<synchronous>, transform_indices = @transform_3, window_bounds = array<i64: 8, 64>}, {pipeline_mode = #tpu.pipeline_mode<synchronous>, transform_indices = @transform_4, window_bounds = array<i64: 1, 64>}, {transform_indices = @transform_5, window_bounds = array<i64: 1, 64, 256>}]} {
    %c0 = arith.constant 0 : index
    %c0_0 = arith.constant 0 : index
    %c0_1 = arith.constant 0 : index
    %0 = vector.load %arg1[%c0, %c0_0, %c0_1] : memref<1x64x256xf32, #tpu.memory_space<vmem>>, vector<1x64x256xf32>
    %cst = arith.constant dense<0.000000e+00> : vector<1x64xf32>
    %1 = vector.multi_reduction <add>, %0, %cst [2] : vector<1x64x256xf32> to vector<1x64xf32>
    %cst_2 = arith.constant 3.906250e-03 : f32
    %2 = vector.broadcast %cst_2 : f32 to vector<1x64xf32>
    %3 = arith.mulf %1, %2 : vector<1x64xf32>
    %c0_3 = arith.constant 0 : index
    %c0_4 = arith.constant 0 : index
    %4 = vector.load %arg2[%c0_3, %c0_4] : memref<64x8xf32, #tpu.memory_space<vmem>>, vector<64x8xf32>
    %cst_5 = arith.constant dense<0.000000e+00> : vector<1x8xf32>
    %5 = tpu.matmul %3, %4, %cst_5 {dimension_numbers = #tpu.dot_dimension_numbers<[1], [0], [0], [1], [0, 0, 1, 1], [], []>} : vector<1x64xf32>, vector<64x8xf32>, vector<1x8xf32> -> vector<1x8xf32>
    %c0_6 = arith.constant 0 : index
    %c0_7 = arith.constant 0 : index
    %6 = vector.load %arg3[%c0_6, %c0_7] : memref<1x8xf32, #tpu.memory_space<vmem>>, vector<1x8xf32>
    %7 = arith.addf %5, %6 : vector<1x8xf32>
    %cst_8 = arith.constant 0.000000e+00 : f32
    %8 = vector.broadcast %cst_8 : f32 to vector<1x8xf32>
    %9 = arith.maximumf %7, %8 : vector<1x8xf32>
    %c0_9 = arith.constant 0 : index
    %c0_10 = arith.constant 0 : index
    %10 = vector.load %arg4[%c0_9, %c0_10] : memref<8x64xf32, #tpu.memory_space<vmem>>, vector<8x64xf32>
    %cst_11 = arith.constant dense<0.000000e+00> : vector<1x64xf32>
    %11 = tpu.matmul %9, %10, %cst_11 {dimension_numbers = #tpu.dot_dimension_numbers<[1], [0], [0], [1], [0, 0, 1, 1], [], []>} : vector<1x8xf32>, vector<8x64xf32>, vector<1x64xf32> -> vector<1x64xf32>
    %c0_12 = arith.constant 0 : index
    %c0_13 = arith.constant 0 : index
    %12 = vector.load %arg5[%c0_12, %c0_13] : memref<1x64xf32, #tpu.memory_space<vmem>>, vector<1x64xf32>
    %13 = arith.addf %11, %12 : vector<1x64xf32>
    %14 = arith.negf %13 : vector<1x64xf32>
    %15 = math.exp %14 : vector<1x64xf32>
    %cst_14 = arith.constant 1.000000e+00 : f32
    %16 = vector.broadcast %cst_14 : f32 to vector<1x64xf32>
    %17 = arith.addf %16, %15 : vector<1x64xf32>
    %18 = arith.divf %16, %17 : vector<1x64xf32>
    %19 = vector.shape_cast %18 : vector<1x64xf32> to vector<1x64x1xf32>
    %20 = vector.broadcast %19 : vector<1x64x1xf32> to vector<1x64x256xf32>
    %21 = arith.mulf %0, %20 : vector<1x64x256xf32>
    %c0_15 = arith.constant 0 : index
    %c0_16 = arith.constant 0 : index
    %c0_17 = arith.constant 0 : index
    %22 = vector.load %arg6[%c0_15, %c0_16, %c0_17] : memref<1x64x256xf32, #tpu.memory_space<vmem>>, vector<1x64x256xf32>
    tpu.vector_store %arg6[%c0_15, %c0_16, %c0_17], %21 {strides = array<i32>} : memref<1x64x256xf32, #tpu.memory_space<vmem>>, vector<1x64x256xf32>,
    return
  }
  func.func @transform_0(%arg0: i32) -> (i32, i32, i32) {
    %c0_i32 = arith.constant 0 : i32
    %c0_i32_0 = arith.constant 0 : i32
    %c0_i32_1 = arith.constant 0 : i32
    return %arg0, %c0_i32, %c0_i32_0 : i32, i32, i32
  }
  func.func @transform_1(%arg0: i32) -> (i32, i32) {
    %c0_i32 = arith.constant 0 : i32
    %c0_i32_0 = arith.constant 0 : i32
    %c0_i32_1 = arith.constant 0 : i32
    return %c0_i32, %c0_i32_0 : i32, i32
  }
  func.func @transform_2(%arg0: i32) -> (i32, i32) {
    %c0_i32 = arith.constant 0 : i32
    %c0_i32_0 = arith.constant 0 : i32
    %c0_i32_1 = arith.constant 0 : i32
    return %c0_i32, %c0_i32_0 : i32, i32
  }
  func.func @transform_3(%arg0: i32) -> (i32, i32) {
    %c0_i32 = arith.constant 0 : i32
    %c0_i32_0 = arith.constant 0 : i32
    %c0_i32_1 = arith.constant 0 : i32
    return %c0_i32, %c0_i32_0 : i32, i32
  }
  func.func @transform_4(%arg0: i32) -> (i32, i32) {
    %c0_i32 = arith.constant 0 : i32
    %c0_i32_0 = arith.constant 0 : i32
    %c0_i32_1 = arith.constant 0 : i32
    return %c0_i32, %c0_i32_0 : i32, i32
  }
  func.func @transform_5(%arg0: i32) -> (i32, i32, i32) {
    %c0_i32 = arith.constant 0 : i32
    %c0_i32_0 = arith.constant 0 : i32
    %c0_i32_1 = arith.constant 0 : i32
    return %arg0, %c0_i32, %c0_i32_0 : i32, i32, i32
  }
}

</mosaic_0001>

<bundles_post_ra>
// kernel: tpu_custom_call.1
= control target key start
LH: loop header
LB: loop body
LE: loop exit
PB: predicated region body
PF: predicated region fallthrough
CT: control target
= control target key end

     0   :  { %10 = vsyncpa [#allocation3], 0  ;;  %s1227_s0 = inlined_call_operand.hbm [shape: f32[2,64,256], index: 0, kind: input, shape index: {}]   ;;  %s1228_s1 = inlined_call_operand.vmem [shape: f32[64,8], index: 1, kind: input, shape index: {}]   ;;  %s1229_s2 = inlined_call_operand.vmem [shape: f32[1,8], index: 2, kind: input, shape index: {}]   ;;  %s1230_s3 = inlined_call_operand.vmem [shape: f32[8,64], index: 3, kind: input, shape index: {}]   ;;  %s1231_s4 = inlined_call_operand.vmem [shape: f32[1,64], index: 4, kind: input, shape index: {}]   ;;  %s1232_s5 = inlined_call_operand.hbm [shape: f32[2,64,256], index: 5, kind: output, shape index: {}]  }
   0x1   :  { %12 = vsyncpa [#allocation3 + $0x1], 0 }
   0x2   :  { %13 = vsyncpa [#allocation4], 0 }
   0x3   :  { %15 = vsyncpa [#allocation4 + $0x1], 0  ;;  %s933_s18 = smov 0   ;;  %s935_s19 = smov 0  }
   0x4   :  { %s937_s20 = smov 0   ;;  %s939_s21 = smov 0  }
   0x5 LB: > { %s954_s22 = sadd.s32 4294967295, %s892_s21   ;;  %s673_s23 = sadd.s32 4294967294, %s892_s21   ;;  %s892_s21 = sphi %s939_s21, %s1245_s21   ;;  %s888_s20 = sphi %s937_s20, %s1244_s20   ;;  %s884_s19 = sphi %s935_s19, %s1243_s19   ;;  %s880_s18 = sphi %s933_s18, %s1242_s18  }
   0x6   : > { %s958_s24 = sadd.s32 1, %s892_s21   ;;  %s28_s25 = sadd.s32 1, %s888_s20 }
   0x7   : > { %s25_s26 = ssub.s32 %s892_s21, %s958_s24  ;;  %p35_p0 = scmp.ne.s32.totalorder %s888_s20, %s884_s19 }
   0x8   : > { %p26_p1 = scmp.eq.s32.totalorder %s25_s26, 0  ;;  %p36_p2 = scmp.eq.s32.totalorder %s892_s21, 0 }
   0x9   : > { %p41_p3 = scmp.ne.s32.totalorder %s884_s19, %s880_s18  ;;  %p42_p4 = scmp.eq.s32.totalorder %s954_s22, 0 }
   0xa   : > { %s970_s27 = scalar_select %p26_p1, %s888_s20, %s28_s25  }
   0xb   : > { %p972_p5 = por %p36_p2, %p35_p0  ;;  %p976_p6 = por %p42_p4, %p41_p3 }
   0xc   : > { %p149_p7 = scmp.eq.s32.totalorder %s954_s22, 1  ;;  %p155_p8 = scmp.eq.s32.totalorder %s673_s23, 1 }
   0xd   : > { %p751_p10 = scmp.lt.s32.totalorder %s892_s21, 2  ;;  %s187_s7 = sand.u32 1, %s888_s20  }
   0xe   : > { %p983_p11 = por %p149_p7, %p35_p0  ;;  %p987_p12 = por %p155_p8, %p41_p3 }
   0xf   : > { %s690_s8 = sshll.u32 %s892_s21, 11  ;;  %s676_s9 = sshll.u32 %s187_s7, 7 }
  0x10   : > { %s1236_s30 = scalar_select %p983_p11, 1, 0 }
  0x11   : > { %s1237_s6 = scalar_select %p987_p12, 1, 0 }
  0x12   : > { %s996_s12 = scalar_lea.hbm %s1227_s0, %s690_s8  ;;  %s191_s13 = scalar_lea.vmem [#allocation2], %s676_s9 }
  0x13   : > { %s198_s14 = sshll.u32 %s191_s13, 4  ;;  %p1000_p13 = pnand %p751_p10, %p972_p5  ;;  %s1004_s14 = int_to_ptr.vmem [resolvable:$true] %s198_s14 }
  0x14   : > { %s1006_s16 = scalar_lea.sflag [#allocation3], %s187_s7  ;;  %s796_s17 = scalar_lea.hbm %s996_s12, 2048 }
  0x15   : > { %p797_p0 = scmp.ne.s32.totalorder %s996_s12, %s796_s17  ;;  %p798_p1 = pneg %p1000_p13 }
  0x16   : > { %s801_s26 = scalar_lea.hbm %s1227_s0, 4096  ;;  %p802_p4 = scmp.lt.u32.totalorder %s996_s12, %s1227_s0 }
  0x17   : > { %p799_p2 = pnand %p798_p1, %p797_p0  ;;  %p803_p5 = scmp.lt.u32.totalorder %s801_s26, %s796_s17 }
  0x18   : > { %p805_p8 = scmp.lt.u32.totalorder %s796_s17, %s996_s12 }
  0x19   : > { %p800_p3 = pneg %p799_p2  ;;  %p804_p7 = por %p803_p5, %p802_p4 }
  0x1b   : > { %p806_p10 = por %p805_p8, %p804_p7 }
  0x1d   : > { %p807_p9 = pnand %p806_p10, %p800_p3 }
  0x1f   : > { %810 = shalt.err (!%p807_p9)
}
  0x20   : > { %s811_s7 = scalar_lea.vmem %s1004_s14, 2048  ;;  %s894_s9 = smov [#allocation2]  }
  0x21   : > { %p812_p0 = scmp.ne.s32.totalorder %s1004_s14, %s811_s7  ;;  %s816_s10 = sshll.u32 %s894_s9, 4  ;;  %s817_s10 = int_to_ptr.vmem [resolvable:$false] %s816_s10 }
  0x22   : > { %s818_s11 = scalar_lea.vmem %s817_s10, 4096  ;;  %p819_p11 = scmp.lt.s32.totalorder %s1004_s14, %s817_s10 }
  0x23   : > { %p814_p2 = pnand %p812_p0, %p798_p1  ;;  %p820_p4 = scmp.lt.s32.totalorder %s818_s11, %s811_s7 }
  0x25   : > { %p815_p12 = pneg %p814_p2  ;;  %p821_p5 = por %p820_p4, %p819_p11 }
  0x27   : > { %p822_p7 = pnand %p821_p5, %p815_p12 }
  0x29   : > { %825 = shalt.err (!%p822_p7)
}
  0x2a   : > { %s895_s13 = smov 256   ;;  %s896_s17 = smov 16  }
  0x2b   : > { %746 = dma.hbm_to_vmem [thread:$0]  (!%p1000_p13), %s996_s12, 2048, %s1004_s14, %s1006_s16, %s895_s13, %s895_s13, %s896_s17  }
  0x2c   : > { %p679_p9 = scmp.ge.s32.totalorder %s892_s21, 1  ;;  %p206_p1 = scmp.lt.s32.totalorder %s892_s21, 3 }
  0x2e   : > { %p207_p3 = pnand %p679_p9, %p206_p1 }
  0x2f   : > { %s1037_s23 = sand.u32 (!%p207_p3), 1, %s884_s19  }
  0x30   : > { %210 = sbr.rel (%p207_p3) target bundleno = 825 (0x339), region = 40  ;;  %s680_s25 = sshll.u32 (!%p207_p3), %s1037_s23, 7 }
  0x31   : > { %s213_s26 = scalar_lea.sflag (!%p207_p3), [#allocation3], %s1037_s23  ;;  %s216_s28 = scalar_lea.vmem (!%p207_p3), [#allocation2], %s680_s25 }
  0x37   : > { %871 = dma.done.wait (%p976_p6), %s213_s26, 2048  }
  0x38   : > { %873 = vsyncadd (%p976_p6), %s213_s26, 4294965248  ;;  %v1047_v0 = vld [vmem:[%s216_s28] sm:$0xff]  ;;  %v1049_v1 = vld [vmem:[%s216_s28 + $0x8] sm:$0xff]  ;;  %v897_v27 = vmov 0.0|0.0   ;;  %vm898_vm0 = vmmov 0   ;;  %v899_v37 = vmov 0.0   ;;  %v308_v38 = vlaneseq }
  0x39   : > { %v1051_v2 = vld [vmem:[%s216_s28 + $0x20] sm:$0xff]  ;;  %v259_v3 = vadd.f32 %v1049_v1, %v1047_v0  ;;  %v1055_v4 = vld [vmem:[%s216_s28 + $0x28] sm:$0xff]  ;;  %v1057_v5 = vld [vmem:[%s216_s28 + $0x10] sm:$0xff]  ;;  %727 = vmatprep.subr.bf16.mxu0 %v897_v27  ;;  %719 = vmatprep.mubr.msk.f32.mxu0 %vm898_vm0, %v899_v37  ;;  %vm319_vm1 = vcmask 130112   ;;  %vm326_vm2 = vcmask 195712   ;;  %vm333_vm3 = vcmask 261312  }
  0x3a   : > { %v1059_v6 = vld [vmem:[%s216_s28 + $0x18] sm:$0xff]  ;;  %v265_v7 = vadd.f32 %v1055_v4, %v1051_v2  ;;  %v1063_v8 = vld [vmem:[%s216_s28 + $0x30] sm:$0xff]  ;;  %v1071_v12 = vld [vmem:[%s216_s28 + $0x40] sm:$0xff]  ;;  %722 = vmatprep.subr.mxu1 %v899_v37  ;;  %724 = vmatprep.mubr.msk.f32.mxu1 %vm898_vm0, %v899_v37  ;;  %v309_v39 = vand.u32 127, %v308_v38  ;;  %v1119_v40 = vshrl.u32 %v308_v38, 7  ;;  %vm340_vm4 = vcmask 326912  }
  0x3b   : > { %v1065_v9 = vld [vmem:[%s216_s28 + $0x38] sm:$0xff]  ;;  %260 = vadd.xlane.f32.xlu0 %v259_v3  ;;  %v262_v10 = vadd.f32 %v1059_v6, %v1057_v5  ;;  %v1073_v13 = vld [vmem:[%s216_s28 + $0x48] sm:$0xff]  ;;  %v1075_v14 = vld [vmem:[%s216_s28 + $0x50] sm:$0xff]  ;;  %vm347_vm5 = vcmask 392512   ;;  %vm354_vm6 = vcmask 458112   ;;  %vm361_vm7 = vcmask 523712  }
  0x3c   : > { %266 = vadd.xlane.f32.xlu1 %v265_v7  ;;  %v268_v11 = vadd.f32 %v1065_v9, %v1063_v8  ;;  %v1077_v15 = vld [vmem:[%s216_s28 + $0x58] sm:$0xff]  ;;  %v271_v16 = vadd.f32 %v1073_v13, %v1071_v12  ;;  %v1083_v18 = vld [vmem:[%s216_s28 + $0x60] sm:$0xff]  ;;  %v1085_v19 = vld [vmem:[%s216_s28 + $0x68] sm:$0xff]  ;;  %v314_v41 = vadd.s32 4294967288, %v309_v39  ;;  %v321_v43 = vadd.s32 4294967280, %v309_v39  ;;  %s1146_s10 = scalar_lea.vmem [#allocation5], %s680_s25 }
  0x3d   : > { %v274_v17 = vadd.f32 %v1077_v15, %v1075_v14  ;;  %v1087_v20 = vld [vmem:[%s216_s28 + $0x70] sm:$0xff]  ;;  %v1089_v21 = vld [vmem:[%s216_s28 + $0x78] sm:$0xff]  ;;  %v277_v22 = vadd.f32 %v1085_v19, %v1083_v18  ;;  %v291_v24 = vld [vmem:[%s1228_s1] sm:$0xff]  ;;  %v328_v44 = vadd.s32 4294967272, %v309_v39  ;;  %v312_v46 = vsub.s32 %v309_v39, %v1119_v40  ;;  %s691_s25 = sshll.u32 %s954_s22, 11  ;;  %s600_s11 = sshll.u32 %s1146_s10, 4  ;;  %s1179_s11 = int_to_ptr.vmem [resolvable:$true] %s600_s11 }
  0x3e   : > { %v280_v23 = vadd.f32 %v1089_v21, %v1087_v20  ;;  %v292_v25 = vld [vmem:[%s1228_s1 + $0x8] sm:$0xff]  ;;  %v293_v28 = vld [vmem:[%s1228_s1 + $0x10] sm:$0xff]  ;;  %v294_v29 = vld [vmem:[%s1228_s1 + $0x18] sm:$0xff]  ;;  %v317_v48 = vsub.s32 %v314_v41, %v1119_v40  ;;  %v335_v49 = vadd.s32 4294967264, %v309_v39  ;;  %v324_v50 = vsub.s32 %v321_v43, %v1119_v40  ;;  %s1177_s26 = scalar_lea.hbm %s1232_s5, %s691_s25  ;;  %s587_s22 = scalar_lea.sflag [#allocation4], %s1037_s23 }
  0x3f   : > { %263 = vadd.xlane.f32.xlu0 %v262_v10  ;;  %v728_v26 = vpack.c.bf16 %v292_v25, %v291_v24  ;;  %v731_v30 = vpack.c.bf16 %v294_v29, %v293_v28  ;;  %v295_v31 = vld [vmem:[%s1228_s1 + $0x20] sm:$0xff]  ;;  %v296_v32 = vld [vmem:[%s1228_s1 + $0x28] sm:$0xff]  ;;  %v297_v34 = vld [vmem:[%s1228_s1 + $0x30] sm:$0xff]  ;;  %v331_v53 = vsub.s32 %v328_v44, %v1119_v40  ;;  %v342_v54 = vadd.s32 4294967256, %v309_v39  ;;  %s826_s28 = scalar_lea.vmem %s1179_s11, 2048  ;;  %p1239_p11 = scmp.ne.s32.totalorder %s1236_s30, 0 }
  0x40   : > { %269 = vadd.xlane.f32.xlu1 %v268_v11  ;;  %v734_v33 = vpack.c.bf16 %v296_v32, %v295_v31  ;;  %v298_v35 = vld [vmem:[%s1228_s1 + $0x38] sm:$0xff]  ;;  %v338_v60 = vsub.s32 %v335_v49, %v1119_v40  ;;  %v349_v61 = vadd.s32 4294967248, %v309_v39  ;;  %v356_v10 = vadd.s32 4294967240, %v309_v39  ;;  %v437_v39 = vld [vmem:[%s1230_s3] sm:$0xff]  ;;  %p827_p6 = scmp.ne.s32.totalorder %s1179_s11, %s826_s28  ;;  %s900_s29 = smov [#allocation5]  }
  0x41   : > { %729 = vmatpush3.bf16.msra.mxu0 %v728_v26  ;;  %v737_v36 = vpack.c.bf16 %v298_v35, %v297_v34  ;;  %v345_v7 = vsub.s32 %v342_v54, %v1119_v40  ;;  %vm363_vm8 = vcmask 523264   ;;  %723 = vmatpush3.msra.mxu1 %v437_v39  ;;  %v299_v41 = vld [vmem:[%s1229_s2] sm:$0x1]  ;;  %vm439_vm9 = vcmask 64512   ;;  %s830_s12 = sshll.u32 %s900_s29, 4  ;;  %s831_s12 = int_to_ptr.vmem [resolvable:$false] %s830_s12 }
  0x42   : > { %730 = vmatprep.subr.bf16.mxu0 %v897_v27  ;;  %v352_v26 = vsub.s32 %v349_v61, %v1119_v40  ;;  %v359_v29 = vsub.s32 %v356_v10, %v1119_v40  ;;  %p828_p12 = pnand %p827_p6, %p1239_p11  ;;  %s832_s14 = scalar_lea.vmem %s831_s12, 4096 }
  0x43   : > { %272 = vadd.xlane.f32.xlu0 %v271_v16  ;;  %p833_p8 = scmp.lt.s32.totalorder %s1179_s11, %s831_s12  ;;  %p834_p10 = scmp.lt.s32.totalorder %s832_s14, %s826_s28 }
  0x44   : > { %275 = vadd.xlane.f32.xlu1 %v274_v17  ;;  %p829_p13 = pneg %p828_p12 }
  0x45   : > { %732 = vmatpush3.bf16.msra.mxu0 %v731_v30  ;;  %p835_p0 = por %p834_p10, %p833_p8 }
  0x46   : > { %733 = vmatprep.subr.bf16.mxu0 %v897_v27 }
  0x47   : > { %278 = vadd.xlane.f32.xlu0 %v277_v22  ;;  %p836_p2 = pnand %p835_p0, %p829_p13 }
  0x48   : > { %281 = vadd.xlane.f32.xlu1 %v280_v23 }
  0x49   : > { %735 = vmatpush3.bf16.msra.mxu0 %v734_v33 }
  0x4a   : > { %736 = vmatprep.subr.bf16.mxu0 %v897_v27 }
  0x4d   : > { %738 = vmatpush3.bf16.msra.mxu0 %v737_v36 }
  0xc8   : > { %v261_v42 = vpop.xlane.xlu0 %260 }
  0xc9   : > { %v267_v45 = vpop.xlane.xlu1 %266  ;;  %v283_v47 = vmul.f32 0.00390625, %v261_v42 }
  0xca   : > { %v285_v51 = vmul.f32 0.00390625, %v267_v45 }
  0xcb   : > { %v313_v58 = vrot.slane %v283_v47, %v312_v46  ;;  %v438_v46 = vld [vmem:[%s1231_s4] sm:$0x1] }
  0xcc   : > { %v264_v52 = vpop.xlane.xlu0 %263  ;;  %v325_v62 = vrot.slane %v285_v51, %v324_v50 }
  0xcd   : > { %v284_v55 = vmul.f32 0.00390625, %v264_v52  ;;  %v270_v56 = vpop.xlane.xlu1 %269 }
  0xce   : > { %v286_v57 = vmul.f32 0.00390625, %v270_v56 }
  0xcf   : > { %v318_v59 = vrot.slane %v284_v55, %v317_v48 }
  0xd0   : > { %v332_v63 = vrot.slane %v286_v57, %v331_v53  ;;  %v273_v3 = vpop.xlane.xlu0 %272  ;;  %v521_v53 = vsub.s32 0, %v1119_v40 }
  0xd1   : > { %v320_v11 = vsel %vm319_vm1, %v318_v59, %v313_v58  ;;  %v287_v16 = vmul.f32 0.00390625, %v273_v3  ;;  %v276_v17 = vpop.xlane.xlu1 %275 }
  0xd2   : > { %v327_v22 = vsel %vm326_vm2, %v325_v62, %v320_v11  ;;  %v288_v23 = vmul.f32 0.00390625, %v276_v17 }
  0xd3   : > { %v334_v24 = vsel %vm333_vm3, %v332_v63, %v327_v22  ;;  %v339_v25 = vrot.slane %v287_v16, %v338_v60 }
  0xd4   : > { %v346_v27 = vrot.slane %v288_v23, %v345_v7  ;;  %v279_v28 = vpop.xlane.xlu0 %278 }
  0xd5   : > { %v341_v30 = vsel %vm340_vm4, %v339_v25, %v334_v24  ;;  %v289_v31 = vmul.f32 0.00390625, %v279_v28  ;;  %v282_v32 = vpop.xlane.xlu1 %281 }
  0xd6   : > { %v290_v33 = vmul.f32 0.00390625, %v282_v32  ;;  %v348_v35 = vsel %vm347_vm5, %v346_v27, %v341_v30 }
  0xd7   : > { %v353_v34 = vrot.slane %v289_v31, %v352_v26 }
  0xd8   : > { %v360_v36 = vrot.slane %v290_v33, %v359_v29 }
  0xd9   : > { %v355_v37 = vsel %vm354_vm6, %v353_v34, %v348_v35 }
  0xda   : > { %v362_v38 = vsel %vm361_vm7, %v360_v36, %v355_v37 }
  0xdb   : > { %720 = vmatmul.mubr.msk.f32.vlgmr.msra.gmra.mrb[0].mxu0 %vm363_vm8, %v362_v38 }
 0x1ae   : > { %v432_v42 = vpop.f32.mrb[0].mxu0 }
 0x1af   : > { %v433_v43 = vadd.f32 %v432_v42, %v299_v41  ;;  %v721_v44 = vpop.f32.mrb[1].mxu0 }
 0x1b1   : > { %v436_v45 = vmax.f32 %v433_v43, 0.0 }
 0x1b3   : > { %725 = vmatmul.mubr.msk.f32.vlgmr.msra.gmra.mrb[0].mxu1 %vm439_vm9, %v436_v45 }
 0x286   : > { %v509_v47 = vpop.f32.mrb[0].mxu1 }
 0x287   : > { %v510_v48 = vadd.f32 %v509_v47, %v438_v46  ;;  %v726_v49 = vpop.f32.mrb[1].mxu1 }
 0x289   : > { %v684_v50 = vmul.f32 -1.442695, %v510_v48 }
 0x28b   : > { %792 = vpow2.f32 %v684_v50 }
 0x295   : > { %v793_v51 = vpop.eup %792 }
 0x296   : > { %v516_v52 = vadd.f32 1.0, %v793_v51 }
 0x298   : > { %794 = vrcp.f32 %v516_v52 }
 0x2a2   : > { %v795_v54 = vpop.eup %794 }
 0x2a3   : > { %v522_v55 = vrot.slane %v795_v54, %v521_v53 }
 0x2a5   : > { %528 = vbcast.lane.b32.xlu1 %v522_v55, 264  ;;  %524 = vbcast.lane.b32.xlu0 %v522_v55, 256 }
 0x2a9   : > { %532 = vbcast.lane.b32.xlu1 %v522_v55, 272  ;;  %540 = vbcast.lane.b32.xlu0 %v522_v55, 288 }
 0x2ad   : > { %536 = vbcast.lane.b32.xlu1 %v522_v55, 280  ;;  %548 = vbcast.lane.b32.xlu0 %v522_v55, 304 }
 0x2b1   : > { %544 = vbcast.lane.b32.xlu1 %v522_v55, 296 }
 0x2b5   : > { %552 = vbcast.lane.b32.xlu1 %v522_v55, 312 }
 0x317   : > { %v529_v56 = vpop.permute.xlu1 %528  ;;  %v525_v57 = vpop.permute.xlu0 %524 }
 0x318   : > { %v556_v58 = vmul.f32 %v529_v56, %v1057_v5  ;;  %v557_v59 = vmul.f32 %v529_v56, %v1059_v6  ;;  %v554_v60 = vmul.f32 %v525_v57, %v1047_v0  ;;  %v555_v40 = vmul.f32 %v525_v57, %v1049_v1 }
 0x31a   : > { %572 = vst [vmem:[%s1146_s10 + $0x10] sm:$0xff] %v556_v58  ;;  %573 = vst [vmem:[%s1146_s10 + $0x18] sm:$0xff] %v557_v59 }
 0x31b   : > { %570 = vst [vmem:[%s1146_s10] sm:$0xff] %v554_v60  ;;  %571 = vst [vmem:[%s1146_s10 + $0x8] sm:$0xff] %v555_v40  ;;  %v533_v5 = vpop.permute.xlu1 %532  ;;  %v541_v0 = vpop.permute.xlu0 %540 }
 0x31c   : > { %v558_v1 = vmul.f32 %v533_v5, %v1051_v2  ;;  %v559_v6 = vmul.f32 %v533_v5, %v1055_v4  ;;  %v562_v61 = vmul.f32 %v541_v0, %v1071_v12  ;;  %v563_v62 = vmul.f32 %v541_v0, %v1073_v13 }
 0x31e   : > { %574 = vst [vmem:[%s1146_s10 + $0x20] sm:$0xff] %v558_v1  ;;  %575 = vst [vmem:[%s1146_s10 + $0x28] sm:$0xff] %v559_v6 }
 0x31f   : > { %578 = vst [vmem:[%s1146_s10 + $0x40] sm:$0xff] %v562_v61  ;;  %579 = vst [vmem:[%s1146_s10 + $0x48] sm:$0xff] %v563_v62  ;;  %v537_v63 = vpop.permute.xlu1 %536  ;;  %v549_v3 = vpop.permute.xlu0 %548 }
 0x320   : > { %v560_v2 = vmul.f32 %v537_v63, %v1063_v8  ;;  %v561_v7 = vmul.f32 %v537_v63, %v1065_v9  ;;  %v566_v4 = vmul.f32 %v549_v3, %v1083_v18  ;;  %v567_v12 = vmul.f32 %v549_v3, %v1085_v19 }
 0x322   : > { %576 = vst [vmem:[%s1146_s10 + $0x30] sm:$0xff] %v560_v2  ;;  %577 = vst [vmem:[%s1146_s10 + $0x38] sm:$0xff] %v561_v7 }
 0x323   : > { %582 = vst [vmem:[%s1146_s10 + $0x60] sm:$0xff] %v566_v4  ;;  %583 = vst [vmem:[%s1146_s10 + $0x68] sm:$0xff] %v567_v12  ;;  %v545_v13 = vpop.permute.xlu1 %544 }
 0x324   : > { %v564_v10 = vmul.f32 %v545_v13, %v1075_v14  ;;  %v565_v11 = vmul.f32 %v545_v13, %v1077_v15 }
 0x326   : > { %580 = vst [vmem:[%s1146_s10 + $0x50] sm:$0xff] %v564_v10  ;;  %581 = vst [vmem:[%s1146_s10 + $0x58] sm:$0xff] %v565_v11 }
 0x327   : > { %v553_v8 = vpop.permute.xlu1 %552 }
 0x328   : > { %v568_v9 = vmul.f32 %v553_v8, %v1087_v20  ;;  %v569_v14 = vmul.f32 %v553_v8, %v1089_v21 }
 0x32a   : > { %584 = vst [vmem:[%s1146_s10 + $0x70] sm:$0xff] %v568_v9  ;;  %585 = vst [vmem:[%s1146_s10 + $0x78] sm:$0xff] %v569_v14 }
 0x32b   : > { %839 = shalt.err (!%p836_p2)
}
 0x32c   : > { %s840_s15 = scalar_lea.hbm %s1177_s26, 2048  ;;  %s844_s7 = scalar_lea.hbm %s1232_s5, 4096 }
 0x32d   : > { %p841_p4 = scmp.ne.s32.totalorder %s1177_s26, %s840_s15  ;;  %p845_p9 = scmp.lt.u32.totalorder %s1177_s26, %s1232_s5 }
 0x32e   : > { %p846_p1 = scmp.lt.u32.totalorder %s844_s7, %s840_s15  ;;  %p848_p6 = scmp.lt.u32.totalorder %s840_s15, %s1177_s26 }
 0x32f   : > { %p842_p5 = pnand %p841_p4, %p1239_p11 }
 0x330   : > { %p847_p3 = por %p846_p1, %p845_p9 }
 0x331   : > { %p843_p7 = pneg %p842_p5 }
 0x332   : > { %p849_p12 = por %p848_p6, %p847_p3 }
 0x334   : > { %p850_p13 = pnand %p849_p12, %p843_p7 }
 0x336   : > { %853 = shalt.err (!%p850_p13)
}
 0x337   : > { %s901_s25 = smov 256   ;;  %s902_s13 = smov 16  }
 0x338   : > { %741 = dma.vmem_to_hbm [thread:$0]  (%p1239_p11), %s1179_s11, 2048, %s1177_s26, %s587_s22, %s901_s25, %s901_s25, %s902_s13  }
 0x339 PF: > { %s615_s17 = sand.u32 1, %s880_s18   ;;  %p1240_p8 = scmp.ne.s32.totalorder %s1237_s6, 0 }
 0x33a   : > { %p1241_p10 = scmp.ge.s32.totalorder %s892_s21, 2  ;;  %s616_s28 = scalar_lea.sflag [#allocation4], %s615_s17 }
 0x33c   : > { %p748_p0 = pnand %p1241_p10, %p1240_p8 }
 0x33e   : > { %875 = dma.done.wait (!%p748_p0), %s616_s28, 2048  }
 0x33f   : > { %877 = vsyncadd (!%p748_p0), %s616_s28, 4294965248  ;;  %p18_p2 = scmp.ge.s32.totalorder %s958_s24, 4   ;;  %s1242_s18 = smov %s884_s19 }
 0x340   : > { %s1243_s19 = smov %s888_s20  ;;  %s1244_s20 = smov %s970_s27 }
 0x341   : > { %s1245_s21 = smov %s958_s24  ;;  %20 = sbr.rel (!%p18_p2) target bundleno = 5 (0x5), region = 85 }
 0x348   :  { %621 = vsyncpa [#allocation3], 1 }
 0x349   :  { %623 = vsyncpa [#allocation3 + $0x1], 1 }
 0x34a   :  { %624 = vsyncpa [#allocation4], 1 }
 0x34b   :  { %626 = vsyncpa [#allocation4 + $0x1], 1 }

</bundles_post_ra>
